<compile_context>
chip_gen: v7x
topology: tpu7x:2x2x1
jax: 0.10.0
libtpu: 0.0.40
codegen_flags: <defaults>
</compile_context>

<pallas_src>
import jax
import jax.numpy as jnp
from jax.experimental import pallas as pl
from jax.experimental.pallas import tpu as pltpu

_LN_EPS = 1e-5


# --------------------------------------------------------------------------
# generation-aware VMEM / tiling knobs
# --------------------------------------------------------------------------
def _vmem_budget():
    """Scoped-VMEM budget: v5e/v6e have 128 MiB physical VMEM, v7x has 64 MiB."""
    phys = 64 * 1024 * 1024
    try:
        info = pltpu.get_tpu_info()
        phys = int(getattr(info, "vmem_capacity_bytes", phys))
    except Exception:
        pass
    if phys >= 100 * 1024 * 1024:      # v5e / v6e class
        return 96 * 1024 * 1024
    return 44 * 1024 * 1024            # v7x class (leave pipelining headroom)


_VMEM_LIMIT = _vmem_budget()
_BIG_VMEM = _VMEM_LIMIT >= 64 * 1024 * 1024
_TN_PREF = 1024 if _BIG_VMEM else 512
_TK_PREF = 1024 if _BIG_VMEM else 512
_TM_PREF = 256


def _tile(dim, pref, quantum):
    """Largest tile <= pref that is a multiple of `quantum` and divides `dim`,
    falling back to the full dim (always legal for BlockSpec)."""
    if dim <= pref:
        return dim
    t = (pref // quantum) * quantum
    while t >= quantum:
        if dim % t == 0:
            return t
        t -= quantum
    return dim


def _tile_m(M, pref):
    """Row tile; keeps >= 2 steps on the parallel M axis when cheaply possible
    so both v7x TensorCores get work."""
    t = _tile(M, pref, 8)
    if M // t < 2 and M >= 16:
        half = ((M // 2) // 8) * 8
        if half >= 8 and M % half == 0:
            t = half
    return t


def _gelu_tanh(x):
    # TODO(synk): torch F.gelu default is erf-based; Mosaic has no guaranteed
    # lax.erf lowering, so the tanh approximation is fused in-kernel instead.
    c = 0.7978845608028654  # sqrt(2/pi)
    return 0.5 * x * (1.0 + jnp.tanh(c * (x + 0.044715 * x * x * x)))


# --------------------------------------------------------------------------
# Pallas kernels
# --------------------------------------------------------------------------
def linear(x2d, w, b, act=None, residual=None, ln=None):
    """y = act(x2d @ w + b) [+ residual, LayerNorm] in one fused kernel.

    * x tile cast to bf16 in-kernel, w stored/cast bf16 -> native MXU rate,
      f32 accumulation into the resident output block (no VMEM scratch).
    * Optional epilogue fuses activation, residual add and LayerNorm
      (LayerNorm fusion requires tn == N, i.e. one full output row per block).
    """
    M, K = x2d.shape
    N = w.shape[1]
    fuse_ln = ln is not None
    tm = _tile_m(M, _TM_PREF)
    tn = N if fuse_ln else _tile(N, _TN_PREF, 128)
    tk = _tile(K, _TK_PREF, 128)
    nk = K // tk
    grid = (M // tm, N // tn, nk)

    def kernel(*refs):
        it = iter(refs)
        x_ref, w_ref, b_ref = next(it), next(it), next(it)
        r_ref = next(it) if residual is not None else None
        if fuse_ln:
            g_ref, gb_ref = next(it), next(it)
        o_ref = next(it)

        @pl.when(pl.program_id(2) == 0)
        def _():
            o_ref[...] = jnp.zeros_like(o_ref)

        o_ref[...] += jnp.dot(x_ref[...].astype(jnp.bfloat16),
                              w_ref[...].astype(jnp.bfloat16),
                              preferred_element_type=jnp.float32)

        @pl.when(pl.program_id(2) == nk - 1)
        def _():
            y = o_ref[...] + b_ref[...]
            if act == "relu":
                y = jnp.maximum(y, 0.0)
            elif act == "gelu":
                y = _gelu_tanh(y)
            if r_ref is not None:
                y = y + r_ref[...]
            if fuse_ln:
                mu = jnp.mean(y, axis=-1, keepdims=True)
                yc = y - mu
                var = jnp.mean(yc * yc, axis=-1, keepdims=True)
                y = yc * jax.lax.rsqrt(var + _LN_EPS) * g_ref[...] + gb_ref[...]
            o_ref[...] = y

    in_specs = [
        pl.BlockSpec((tm, tk), lambda i, j, k: (i, k)),
        pl.BlockSpec((tk, tn), lambda i, j, k: (k, j)),
        pl.BlockSpec((1, tn), lambda i, j, k: (0, j)),
    ]
    args = [x2d, w, b.reshape(1, N)]
    if residual is not None:
        # block index ignores k -> residual is DMA'd once per (i, j), not per k
        in_specs.append(pl.BlockSpec((tm, tn), lambda i, j, k: (i, j)))
        args.append(residual)
    if fuse_ln:
        g, gb = ln
        in_specs.append(pl.BlockSpec((1, tn), lambda i, j, k: (0, j)))
        in_specs.append(pl.BlockSpec((1, tn), lambda i, j, k: (0, j)))
        args.extend([g.reshape(1, N), gb.reshape(1, N)])

    return pl.pallas_call(
        kernel,
        out_shape=jax.ShapeDtypeStruct((M, N), jnp.float32),
        grid=grid,
        in_specs=in_specs,
        out_specs=pl.BlockSpec((tm, tn), lambda i, j, k: (i, j)),
        compiler_params=pltpu.CompilerParams(
            dimension_semantics=("parallel", "parallel", "arbitrary"),
            vmem_limit_bytes=_VMEM_LIMIT),
    )(*args)


def layer_norm(x2d, gamma, beta):
    """Row-tiled LayerNorm over the last axis (used only for the pre-encoders
    that have no preceding matmul to fuse into)."""
    M, D = x2d.shape
    tm = _tile_m(M, 512)

    def kernel(x_ref, g_ref, b_ref, o_ref):
        x = x_ref[...]
        mu = jnp.mean(x, axis=-1, keepdims=True)
        xc = x - mu
        var = jnp.mean(xc * xc, axis=-1, keepdims=True)
        o_ref[...] = xc * jax.lax.rsqrt(var + _LN_EPS) * g_ref[...] + b_ref[...]

    row = pl.BlockSpec((tm, D), lambda i: (i, 0))
    vec = pl.BlockSpec((1, D), lambda i: (0, 0))
    return pl.pallas_call(
        kernel,
        out_shape=jax.ShapeDtypeStruct((M, D), jnp.float32),
        grid=(M // tm,),
        in_specs=[row, vec, vec],
        out_specs=row,
        compiler_params=pltpu.CompilerParams(
            dimension_semantics=("parallel",),
            vmem_limit_bytes=_VMEM_LIMIT),
    )(x2d, gamma.reshape(1, D), beta.reshape(1, D))


def attention(qkv_q, qkv_kv, m_q, m_k, n_head, d_model, scale, self_attn):
    """Fused multi-head attention.

    qkv_q  : (B*Lq, 3*d_model)  packed [Q | K | V] projection of the query stream
    qkv_kv : (B*Lk, 3*d_model)  packed projection of the key/value stream
             (same array as qkv_q for self-attention -> single DMA)
    m_q    : (B, Lq, 1)   query-side mask,   m_k : (B, 1, Lk) key-side mask

    Q/K/V are sliced out of the packed block in-kernel (no split_heads HBM
    transpose), the additive bias (m_q*m_k - 1)*1e4 is rebuilt in-kernel, the
    softmax scale is folded into Q, QK^T and PV run in bf16 with f32 scores,
    and the context is written lane-dense in merged-head layout (B*Lq, d_model).
    """
    B, Lq = m_q.shape[0], m_q.shape[1]
    Lk = m_k.shape[2]
    D3 = qkv_q.shape[1]
    assert D3 == 3 * d_model and qkv_kv.shape[1] == D3
    assert d_model % n_head == 0
    dh = d_model // n_head

    def kernel(mq_ref, mk_ref, *refs):
        if self_attn:
            q_src, kv_src, o_ref = refs[0], refs[0], refs[1]
        else:
            q_src, kv_src, o_ref = refs
        bias = (mq_ref[0] * mk_ref[0] - 1.0) * 10000.0            # (Lq, Lk)
        ctx = []
        for h in range(n_head):                                    # unrolled
            q = (q_src[:, h * dh:(h + 1) * dh] * scale).astype(jnp.bfloat16)
            k = kv_src[:, d_model + h * dh:
                          d_model + (h + 1) * dh].astype(jnp.bfloat16)
            v = kv_src[:, 2 * d_model + h * dh:
                          2 * d_model + (h + 1) * dh].astype(jnp.bfloat16)
            s = jnp.einsum("qd,kd->qk", q, k,
                           preferred_element_type=jnp.float32) + bias
            s = s - jnp.max(s, axis=-1, keepdims=True)
            p = jnp.exp(s)
            p = p * pl.reciprocal(jnp.sum(p, axis=-1, keepdims=True), approx=True)
            ctx.append(jnp.dot(p.astype(jnp.bfloat16), v,
                               preferred_element_type=jnp.float32))
        o_ref[...] = jnp.concatenate(ctx, axis=-1)                 # lane-dense store

    in_specs = [
        pl.BlockSpec((1, Lq, 1), lambda b: (b, 0, 0)),
        pl.BlockSpec((1, 1, Lk), lambda b: (b, 0, 0)),
        pl.BlockSpec((Lq, D3), lambda b: (b, 0)),
    ]
    args = [m_q, m_k, qkv_q]
    if not self_attn:
        # TODO(synk): cross-attention over-fetches the unused Q (kv stream) and
        # K/V (q stream) column regions; column-sliced BlockSpecs need
        # 128-aligned widths, which d_model only guarantees at production sizes.
        in_specs.append(pl.BlockSpec((Lk, D3), lambda b: (b, 0)))
        args.append(qkv_kv)

    return pl.pallas_call(
        kernel,
        out_shape=jax.ShapeDtypeStruct((B * Lq, d_model), jnp.float32),
        grid=(B,),
        in_specs=in_specs,
        out_specs=pl.BlockSpec((Lq, d_model), lambda b: (b, 0)),
        compiler_params=pltpu.CompilerParams(
            dimension_semantics=("parallel",),
            vmem_limit_bytes=_VMEM_LIMIT),
    )(*args)


# --------------------------------------------------------------------------
# Transformer layers (post-LN, preprocess='' / postprocess='dan')
# --------------------------------------------------------------------------
def encoder_layer(x, p, m_q, m_k, n_head):
    B, L, D = x.shape
    x2d = x.reshape(B * L, D)
    qkv = linear(x2d, p["w_qkv"], p["b_qkv"])                       # (B*L, 3D)
    dh = D // n_head
    ctx = attention(qkv, qkv, m_q, m_k, n_head, D, dh ** -0.5, self_attn=True)
    # output projection + residual + LayerNorm fused in one kernel
    y = linear(ctx, p["wo"], p["bo"], residual=x2d, ln=(p["ln1_g"], p["ln1_b"]))
    h = linear(y, p["w_ffn1"], p["b_ffn1"], act="gelu")
    out = linear(h, p["w_ffn2"], p["b_ffn2"], residual=y, ln=(p["ln2_g"], p["ln2_b"]))
    return out.reshape(B, L, D)


def co_layer(t, v, p, m_t, m_t_row, m_v, m_v_row, co_head):
    """ERNIE-ViL co-attention block: text queries attend over image keys/values
    and image queries over text keys/values in the shared co-attention space,
    then per-stream FFN."""
    B, Lt, D = t.shape
    _, Lv, VD = v.shape
    CO = p["w_qkv_t"].shape[1] // 3
    dh = CO // co_head
    scale = dh ** -0.5

    t2d = t.reshape(B * Lt, D)
    v2d = v.reshape(B * Lv, VD)

    qkv_t = linear(t2d, p["w_qkv_t"], p["b_qkv_t"])                 # (B*Lt, 3CO)
    qkv_v = linear(v2d, p["w_qkv_v"], p["b_qkv_v"])                 # (B*Lv, 3CO)

    ctx_t = attention(qkv_t, qkv_v, m_t, m_v_row, co_head, CO, scale, self_attn=False)
    ctx_v = attention(qkv_v, qkv_t, m_v, m_t_row, co_head, CO, scale, self_attn=False)

    yt = linear(ctx_t, p["wo_t"], p["bo_t"], residual=t2d, ln=(p["ln1_t_g"], p["ln1_t_b"]))
    yv = linear(ctx_v, p["wo_v"], p["bo_v"], residual=v2d, ln=(p["ln1_v_g"], p["ln1_v_b"]))

    ht = linear(yt, p["w_ffn1_t"], p["b_ffn1_t"], act="gelu")
    out_t = linear(ht, p["w_ffn2_t"], p["b_ffn2_t"], residual=yt,
                   ln=(p["ln2_t_g"], p["ln2_t_b"]))

    hv = linear(yv, p["w_ffn1_v"], p["b_ffn1_v"], act="gelu")
    out_v = linear(hv, p["w_ffn2_v"], p["b_ffn2_v"], residual=yv,
                   ln=(p["ln2_v_g"], p["ln2_v_b"]))

    return out_t.reshape(B, Lt, D), out_v.reshape(B, Lv, VD)


# --------------------------------------------------------------------------
# Parameter init (deterministic, synthetic; matmul weights stored in bf16)
# --------------------------------------------------------------------------
def _w(key, shape, scale=0.02, dtype=jnp.bfloat16):
    return (scale * jax.random.normal(key, shape, jnp.float32)).astype(dtype)


def _self_layer_params(keys, d_model, d_inner):
    k = lambda: next(keys)
    z = lambda n: jnp.zeros((n,), jnp.float32)
    o = lambda n: jnp.ones((n,), jnp.float32)
    return dict(
        w_qkv=_w(k(), (d_model, 3 * d_model)), b_qkv=z(3 * d_model),
        wo=_w(k(), (d_model, d_model)), bo=z(d_model),
        ln1_g=o(d_model), ln1_b=z(d_model),
        w_ffn1=_w(k(), (d_model, d_inner)), b_ffn1=z(d_inner),
        w_ffn2=_w(k(), (d_inner, d_model)), b_ffn2=z(d_model),
        ln2_g=o(d_model), ln2_b=z(d_model),
    )


def _co_layer_params(keys, d_model, v_model, co_model, d_inner, v_inner):
    k = lambda: next(keys)
    z = lambda n: jnp.zeros((n,), jnp.float32)
    o = lambda n: jnp.ones((n,), jnp.float32)
    return dict(
        w_qkv_t=_w(k(), (d_model, 3 * co_model)), b_qkv_t=z(3 * co_model),
        w_qkv_v=_w(k(), (v_model, 3 * co_model)), b_qkv_v=z(3 * co_model),
        wo_t=_w(k(), (co_model, d_model)), bo_t=z(d_model),
        wo_v=_w(k(), (co_model, v_model)), bo_v=z(v_model),
        ln1_t_g=o(d_model), ln1_t_b=z(d_model),
        ln1_v_g=o(v_model), ln1_v_b=z(v_model),
        w_ffn1_t=_w(k(), (d_model, d_inner)), b_ffn1_t=z(d_inner),
        w_ffn2_t=_w(k(), (d_inner, d_model)), b_ffn2_t=z(d_model),
        ln2_t_g=o(d_model), ln2_t_b=z(d_model),
        w_ffn1_v=_w(k(), (v_model, v_inner)), b_ffn1_v=z(v_inner),
        w_ffn2_v=_w(k(), (v_inner, v_model)), b_ffn2_v=z(v_model),
        ln2_v_g=o(v_model), ln2_v_b=z(v_model),
    )


def init_params(key, cfg):
    D = cfg["hidden_size"]
    VD = cfg["v_hidden_size"]
    CO = cfg["co_hidden_size"]
    V_FEAT = 2048  # hardcoded in the reference module
    keys = iter(jax.random.split(key, 512))
    k = lambda: next(keys)
    z = lambda n: jnp.zeros((n,), jnp.float32)
    o = lambda n: jnp.ones((n,), jnp.float32)

    p = dict(
        word_emb=_w(k(), (cfg["vocab_size"], D), dtype=jnp.float32),
        pos_emb=_w(k(), (cfg["max_position_embeddings"], D), dtype=jnp.float32),
        sent_emb=_w(k(), (cfg["sent_type_vocab_size"], D), dtype=jnp.float32),
        pre_ln_g=o(D), pre_ln_b=z(D),
        img_w=_w(k(), (V_FEAT, VD)), img_b=z(VD),
        loc_w=_w(k(), (5, VD)), loc_b=z(VD),
        vl_pre_ln_g=o(VD), vl_pre_ln_b=z(VD),
        pooled_fc_text_w=_w(k(), (D, CO)), pooled_fc_text_b=z(CO),
        pooled_fc_image_w=_w(k(), (VD, CO)), pooled_fc_image_b=z(CO),
    )
    n_t_layers = cfg["num_hidden_layers"]
    n_v_layers = cfg["v_biattention_id"][-1]
    n_co_layers = len(cfg["v_biattention_id"])
    p["t_layers"] = [_self_layer_params(keys, D, 4 * D) for _ in range(n_t_layers)]
    p["v_layers"] = [_self_layer_params(keys, VD, cfg["v_intermediate_size"])
                     for _ in range(n_v_layers)]
    p["co_layers"] = [_co_layer_params(keys, D, VD, CO, 4 * D,
                                       cfg["v_intermediate_size"])
                      for _ in range(n_co_layers)]
    return p


# --------------------------------------------------------------------------
# Full forward pass (mirrors ErnieVilModel.forward, eval mode)
# --------------------------------------------------------------------------
def ernie_vil_forward(params, cfg, src_ids, position_ids, sentence_ids, task_ids,
                      input_mask, image_embeddings, image_loc, input_image_mask,
                      pooled_output=False, match_score=False,
                      fusion_method="mul"):
    del task_ids  # not used by the reference forward
    B, Lt = src_ids.shape
    D = cfg["hidden_size"]
    VD = cfg["v_hidden_size"]
    H = cfg["num_attention_heads"]
    VH = cfg["v_num_attention_heads"]
    COH = cfg["co_num_attention_heads"]

    # text embeddings + pre_encoder ('nd' = layernorm, dropout(identity))
    emb = (jnp.take(params["word_emb"], src_ids, axis=0)
           + jnp.take(params["pos_emb"], position_ids, axis=0)
           + jnp.take(params["sent_emb"], sentence_ids, axis=0))
    t2d = layer_norm(emb.reshape(B * Lt, D), params["pre_ln_g"], params["pre_ln_b"])

    # image embeddings: loc projection, then image projection with the loc
    # residual and the vl_pre_encoder LayerNorm fused into its epilogue
    Lv = image_embeddings.shape[1]
    loc2d = linear(image_loc.reshape(B * Lv, 5), params["loc_w"], params["loc_b"])
    v2d = linear(image_embeddings.reshape(B * Lv, -1), params["img_w"], params["img_b"],
                 residual=loc2d, ln=(params["vl_pre_ln_g"], params["vl_pre_ln_b"]))

    # masks kept as vectors; the additive bias (m_q*m_k - 1)*1e4 is built
    # inside the attention kernel (no B*H*L*L bias ever hits HBM).
    mask_t = input_mask                                      # (B, Lt, 1)
    mask_v = input_image_mask                                # (B, Lv, 1)
    mask_t_row = jnp.transpose(input_mask, (0, 2, 1))        # (B, 1, Lt)
    mask_v_row = jnp.transpose(input_image_mask, (0, 2, 1))  # (B, 1, Lv)

    t = t2d.reshape(B, Lt, D)
    v = v2d.reshape(B, Lv, VD)

    # two-stream encoder with co-attention blocks
    t_start = v_start = 0
    for blk, (v_end, t_end) in enumerate(zip(cfg["v_biattention_id"],
                                             cfg["t_biattention_id"])):
        for idx in range(t_start, t_end):
            t = encoder_layer(t, params["t_layers"][idx], mask_t, mask_t_row, H)
        for idx in range(v_start, v_end):
            v = encoder_layer(v, params["v_layers"][idx], mask_v, mask_v_row, VH)
        t, v = co_layer(t, v, params["co_layers"][blk],
                        mask_t, mask_t_row, mask_v, mask_v_row, COH)
        t_start, v_start = t_end, v_end
    for idx in range(t_start, cfg["num_hidden_layers"]):
        t = encoder_layer(t, params["t_layers"][idx], mask_t, mask_t_row, H)

    enc_out, enc_vl_out = t, v

    if match_score or pooled_output:
        text_cls = linear(enc_out[:, 0, :], params["pooled_fc_text_w"],
                          params["pooled_fc_text_b"], act="relu")
        image_cls = linear(enc_vl_out[:, 0, :], params["pooled_fc_image_w"],
                           params["pooled_fc_image_b"], act="relu")
        if match_score:
            if fusion_method == "mul":
                return text_cls * image_cls
            elif fusion_method == "sum":
                return text_cls + image_cls
            raise ValueError(fusion_method)
        return text_cls, image_cls
    return enc_out, enc_vl_out


# --------------------------------------------------------------------------
if __name__ == "__main__":
    cfg = dict(
        hidden_size=32,
        num_hidden_layers=2,
        num_attention_heads=4,
        v_num_attention_heads=4,
        v_hidden_size=32,
        v_intermediate_size=64,
        co_num_attention_heads=4,
        co_hidden_size=32,
        co_intermediate_size=64,
        vocab_size=64,
        class_size=10,
        class_attr_size=10,
        max_position_embeddings=16,
        sent_type_vocab_size=4,
        task_type_vocab_size=4,
        hidden_act="gelu",
        hidden_dropout_prob=0.1,
        attention_probs_dropout_prob=0.1,
        v_biattention_id=[1],
        t_biattention_id=[1],
    )

    key = jax.random.PRNGKey(0)
    pkey, ikey = jax.random.split(key)
    params = init_params(pkey, cfg)

    B, Lt, Lv = 2, 8, 8
    ks = jax.random.split(ikey, 6)
    src_ids = jax.random.randint(ks[0], (B, Lt), 0, cfg["vocab_size"])
    position_ids = jnp.broadcast_to(jnp.arange(Lt, dtype=jnp.int32), (B, Lt))
    sentence_ids = jax.random.randint(ks[1], (B, Lt), 0, cfg["sent_type_vocab_size"])
    task_ids = jnp.zeros((B, Lt), jnp.int32)
    input_mask = jnp.concatenate(
        [jnp.ones((B, Lt - 2, 1), jnp.float32), jnp.zeros((B, 2, 1), jnp.float32)],
        axis=1)
    image_embeddings = jax.random.normal(ks[2], (B, Lv, 2048), jnp.float32)
    image_loc = jax.random.uniform(ks[3], (B, Lv, 5), jnp.float32)
    input_image_mask = jnp.ones((B, Lv, 1), jnp.float32)

    enc_out, enc_vl_out = ernie_vil_forward(
        params, cfg, src_ids, position_ids, sentence_ids, task_ids,
        input_mask, image_embeddings, image_loc, input_image_mask)

    jax.block_until_ready((enc_out, enc_vl_out))
    assert enc_out.shape == (B, Lt, cfg["hidden_size"])
    assert enc_vl_out.shape == (B, Lv, cfg["v_hidden_size"])
    assert bool(jnp.all(jnp.isfinite(enc_out))) and bool(jnp.all(jnp.isfinite(enc_vl_out)))
    print("KERNEL_OK")
</pallas_src>

<mosaic_0001>
module attributes {stable_mosaic.version = 11 : i64} {
  func.func @kernel(%arg0: i32, %arg1: memref<8x32xf32, #tpu.memory_space<vmem>>, %arg2: memref<1x32xf32, #tpu.memory_space<vmem>>, %arg3: memref<1x32xf32, #tpu.memory_space<vmem>>, %arg4: memref<8x32xf32, #tpu.memory_space<vmem>>) attributes {dimension_semantics = [#tpu.dimension_semantics<parallel>], iteration_bounds = array<i64: 2>, scalar_prefetch = 0 : i64, scratch_operands = 0 : i64, tpu.core_type = #tpu.core_type<tc>, window_params = [{transform_indices = @transform_0, window_bounds = array<i64: 8, 32>}, {pipeline_mode = #tpu.pipeline_mode<synchronous>, transform_indices = @transform_1, window_bounds = array<i64: 1, 32>}, {pipeline_mode = #tpu.pipeline_mode<synchronous>, transform_indices = @transform_2, window_bounds = array<i64: 1, 32>}, {transform_indices = @transform_3, window_bounds = array<i64: 8, 32>}]} {
    %c0 = arith.constant 0 : index
    %c0_0 = arith.constant 0 : index
    %0 = vector.load %arg1[%c0, %c0_0] : memref<8x32xf32, #tpu.memory_space<vmem>>, vector<8x32xf32>
    %cst = arith.constant dense<0.000000e+00> : vector<8xf32>
    %1 = vector.multi_reduction <add>, %0, %cst [1] : vector<8x32xf32> to vector<8xf32>
    %2 = vector.shape_cast %1 : vector<8xf32> to vector<8x1xf32>
    %cst_1 = arith.constant 3.200000e+01 : f32
    %3 = vector.broadcast %cst_1 : f32 to vector<8x1xf32>
    %4 = arith.divf %2, %3 : vector<8x1xf32>
    %5 = vector.broadcast %4 : vector<8x1xf32> to vector<8x32xf32>
    %6 = arith.subf %0, %5 : vector<8x32xf32>
    %7 = arith.mulf %6, %6 : vector<8x32xf32>
    %cst_2 = arith.constant dense<0.000000e+00> : vector<8xf32>
    %8 = vector.multi_reduction <add>, %7, %cst_2 [1] : vector<8x32xf32> to vector<8xf32>
    %9 = vector.shape_cast %8 : vector<8xf32> to vector<8x1xf32>
    %cst_3 = arith.constant 3.200000e+01 : f32
    %10 = vector.broadcast %cst_3 : f32 to vector<8x1xf32>
    %11 = arith.divf %9, %10 : vector<8x1xf32>
    %cst_4 = arith.constant 9.99999974E-6 : f32
    %12 = vector.broadcast %cst_4 : f32 to vector<8x1xf32>
    %13 = arith.addf %11, %12 : vector<8x1xf32>
    %14 = math.rsqrt %13 : vector<8x1xf32>
    %15 = vector.broadcast %14 : vector<8x1xf32> to vector<8x32xf32>
    %16 = arith.mulf %6, %15 : vector<8x32xf32>
    %c0_5 = arith.constant 0 : index
    %c0_6 = arith.constant 0 : index
    %17 = vector.load %arg2[%c0_5, %c0_6] : memref<1x32xf32, #tpu.memory_space<vmem>>, vector<1x32xf32>
    %18 = vector.broadcast %17 : vector<1x32xf32> to vector<8x32xf32>
    %19 = arith.mulf %16, %18 : vector<8x32xf32>
    %c0_7 = arith.constant 0 : index
    %c0_8 = arith.constant 0 : index
    %20 = vector.load %arg3[%c0_7, %c0_8] : memref<1x32xf32, #tpu.memory_space<vmem>>, vector<1x32xf32>
    %21 = vector.broadcast %20 : vector<1x32xf32> to vector<8x32xf32>
    %22 = arith.addf %19, %21 : vector<8x32xf32>
    %c0_9 = arith.constant 0 : index
    %c0_10 = arith.constant 0 : index
    %23 = vector.load %arg4[%c0_9, %c0_10] : memref<8x32xf32, #tpu.memory_space<vmem>>, vector<8x32xf32>
    tpu.vector_store %arg4[%c0_9, %c0_10], %22 {strides = array<i32>} : memref<8x32xf32, #tpu.memory_space<vmem>>, vector<8x32xf32>,
    return
  }
  func.func @transform_0(%arg0: i32) -> (i32, i32) {
    %c0_i32 = arith.constant 0 : i32
    %c0_i32_0 = arith.constant 0 : i32
    return %arg0, %c0_i32 : i32, i32
  }
  func.func @transform_1(%arg0: i32) -> (i32, i32) {
    %c0_i32 = arith.constant 0 : i32
    %c0_i32_0 = arith.constant 0 : i32
    %c0_i32_1 = arith.constant 0 : i32
    return %c0_i32, %c0_i32_0 : i32, i32
  }
  func.func @transform_2(%arg0: i32) -> (i32, i32) {
    %c0_i32 = arith.constant 0 : i32
    %c0_i32_0 = arith.constant 0 : i32
    %c0_i32_1 = arith.constant 0 : i32
    return %c0_i32, %c0_i32_0 : i32, i32
  }
  func.func @transform_3(%arg0: i32) -> (i32, i32) {
    %c0_i32 = arith.constant 0 : i32
    %c0_i32_0 = arith.constant 0 : i32
    return %arg0, %c0_i32 : i32, i32
  }
}

</mosaic_0001>

<bundles_post_ra>
// kernel: tpu_custom_call.1
= control target key start
LH: loop header
LB: loop body
LE: loop exit
PB: predicated region body
PF: predicated region fallthrough
CT: control target
= control target key end

     0   :  { %8 = vsyncpa [#allocation3], 0  ;;  %s655_s0 = inlined_call_operand.hbm [shape: f32[16,32], index: 0, kind: input, shape index: {}]   ;;  %s656_s1 = inlined_call_operand.vmem [shape: f32[1,32], index: 1, kind: input, shape index: {}]   ;;  %s657_s2 = inlined_call_operand.vmem [shape: f32[1,32], index: 2, kind: input, shape index: {}]   ;;  %s658_s3 = inlined_call_operand.hbm [shape: f32[16,32], index: 3, kind: output, shape index: {}]  }
   0x1   :  { %10 = vsyncpa [#allocation3 + $0x1], 0 }
   0x2   :  { %11 = vsyncpa [#allocation4], 0 }
   0x3   :  { %13 = vsyncpa [#allocation4 + $0x1], 0  ;;  %s485_s12 = smov 0   ;;  %s487_s13 = smov 0  }
   0x4   :  { %s489_s14 = smov 0   ;;  %s491_s15 = smov 0  }
   0x5 LB: > { %s506_s16 = sadd.s32 4294967295, %s461_s15   ;;  %s303_s17 = sadd.s32 4294967294, %s461_s15   ;;  %s461_s15 = sphi %s491_s15, %s673_s15   ;;  %s457_s14 = sphi %s489_s14, %s672_s14   ;;  %s453_s13 = sphi %s487_s13, %s671_s13   ;;  %s449_s12 = sphi %s485_s12, %s670_s12  }
   0x6   : > { %s510_s18 = sadd.s32 1, %s461_s15   ;;  %s26_s19 = sadd.s32 1, %s457_s14 }
   0x7   : > { %s23_s20 = ssub.s32 %s461_s15, %s510_s18  ;;  %p33_p0 = scmp.ne.s32.totalorder %s457_s14, %s453_s13 }
   0x8   : > { %p24_p1 = scmp.eq.s32.totalorder %s23_s20, 0  ;;  %p34_p2 = scmp.eq.s32.totalorder %s461_s15, 0 }
   0x9   : > { %p39_p3 = scmp.ne.s32.totalorder %s453_s13, %s449_s12  ;;  %p40_p4 = scmp.eq.s32.totalorder %s506_s16, 0 }
   0xa   : > { %s522_s21 = scalar_select %p24_p1, %s457_s14, %s26_s19  }
   0xb   : > { %p524_p5 = por %p34_p2, %p33_p0  ;;  %p528_p6 = por %p40_p4, %p39_p3 }
   0xc   : > { %p105_p7 = scmp.eq.s32.totalorder %s506_s16, 1  ;;  %p111_p8 = scmp.eq.s32.totalorder %s303_s17, 1 }
   0xd   : > { %p329_p10 = scmp.lt.s32.totalorder %s461_s15, 2  ;;  %s137_s26 = sand.u32 1, %s457_s14  }
   0xe   : > { %p535_p11 = por %p105_p7, %p33_p0  ;;  %p539_p12 = por %p111_p8, %p39_p3 }
   0xf   : > { %s307_s27 = sshll.u32 %s461_s15, 7  ;;  %s306_s28 = sshll.u32 %s137_s26, 3 }
  0x10   : > { %s662_s24 = scalar_select %p535_p11, 1, 0 }
  0x11   : > { %s663_s25 = scalar_select %p539_p12, 1, 0 }
  0x12   : > { %s548_s4 = scalar_lea.hbm %s655_s0, %s307_s27  ;;  %s141_s5 = scalar_lea.vmem [#allocation2], %s306_s28 }
  0x13   : > { %s148_s6 = sshll.u32 %s141_s5, 4  ;;  %p552_p13 = pnand %p329_p10, %p524_p5  ;;  %s556_s6 = int_to_ptr.vmem [resolvable:$true] %s148_s6 }
  0x14   : > { %s138_s8 = scalar_lea.sflag [#allocation3], %s137_s26  ;;  %s365_s9 = scalar_lea.hbm %s548_s4, 128 }
  0x15   : > { %p366_p2 = scmp.ne.s32.totalorder %s548_s4, %s365_s9  ;;  %p367_p3 = pneg %p552_p13 }
  0x16   : > { %s370_s17 = scalar_lea.hbm %s655_s0, 256  ;;  %p371_p5 = scmp.lt.u32.totalorder %s548_s4, %s655_s0 }
  0x17   : > { %p368_p4 = pnand %p367_p3, %p366_p2  ;;  %p372_p8 = scmp.lt.u32.totalorder %s370_s17, %s365_s9 }
  0x18   : > { %p374_p9 = scmp.lt.u32.totalorder %s365_s9, %s548_s4 }
  0x19   : > { %p369_p7 = pneg %p368_p4  ;;  %p373_p10 = por %p372_p8, %p371_p5 }
  0x1b   : > { %p375_p0 = por %p374_p9, %p373_p10 }
  0x1d   : > { %p376_p1 = pnand %p375_p0, %p369_p7 }
  0x1f   : > { %379 = shalt.err (!%p376_p1)
}
  0x20   : > { %s380_s22 = scalar_lea.vmem %s556_s6, 128  ;;  %s463_s26 = smov [#allocation2]  }
  0x21   : > { %p381_p2 = scmp.ne.s32.totalorder %s556_s6, %s380_s22  ;;  %s385_s27 = sshll.u32 %s463_s26, 4  ;;  %s386_s27 = int_to_ptr.vmem [resolvable:$false] %s385_s27 }
  0x22   : > { %s387_s28 = scalar_lea.vmem %s386_s27, 256  ;;  %p388_p11 = scmp.lt.s32.totalorder %s556_s6, %s386_s27 }
  0x23   : > { %p383_p4 = pnand %p381_p2, %p367_p3  ;;  %p389_p5 = scmp.lt.s32.totalorder %s387_s28, %s380_s22 }
  0x25   : > { %p384_p12 = pneg %p383_p4  ;;  %p390_p8 = por %p389_p5, %p388_p11 }
  0x27   : > { %p391_p9 = pnand %p390_p8, %p384_p12 }
  0x29   : > { %394 = shalt.err (!%p391_p9)
}
  0x2a   : > { %324 = dma.hbm_to_vmem [thread:$0]  (!%p552_p13), %s548_s4, 128, %s556_s6, %s138_s8  }
  0x2b   : > { %p665_p0 = scmp.lt.s32.totalorder %s461_s15, 3  ;;  %p666_p1 = scmp.ge.s32.totalorder %s461_s15, 1 }
  0x2d   : > { %p154_p3 = pnand %p666_p1, %p665_p0 }
  0x2e   : > { %s590_s29 = sand.u32 (!%p154_p3), 1, %s453_s13  }
  0x2f   : > { %157 = sbr.rel (%p154_p3) target bundleno = 383 (0x17f), region = 32  ;;  %s309_s30 = sshll.u32 (!%p154_p3), %s590_s29, 3 }
  0x30   : > { %s160_s5 = scalar_lea.sflag (!%p154_p3), [#allocation3], %s590_s29  ;;  %s163_s9 = scalar_lea.vmem (!%p154_p3), [#allocation2], %s309_s30 }
  0x36   : > { %440 = dma.done.wait (%p528_p6), %s160_s5, 128  }
  0x37   : > { %442 = vsyncadd (%p528_p6), %s160_s5, 4294967168  ;;  %vm187_vm0 = vcmask 261120   ;;  %v186_v0 = vld [vmem:[%s163_s9] sm:$0xff]  ;;  %s314_s8 = sshll.u32 %s506_s16, 7  ;;  %s185_s10 = scalar_lea.vmem [#allocation5], %s309_s30 }
  0x38   : > { %v188_v1 = vsel %vm187_vm0, %v186_v0, 0.0  ;;  %v311_v11 = vld [vmem:[%s656_s1] ss:$0 sm:$0xff]  ;;  %s233_s11 = sshll.u32 %s185_s10, 4  ;;  %s610_s20 = scalar_lea.hbm %s658_s3, %s314_s8  ;;  %s612_s11 = int_to_ptr.vmem [resolvable:$true] %s233_s11 }
  0x39   : > { %189 = vadd.xlane.f32.xlu0 %v188_v1  ;;  %v312_v13 = vld [vmem:[%s657_s2] ss:$0 sm:$0xff]  ;;  %s220_s22 = scalar_lea.sflag [#allocation4], %s590_s29  ;;  %s395_s26 = scalar_lea.vmem %s612_s11, 128 }
  0x3a   : > { %p396_p6 = scmp.ne.s32.totalorder %s612_s11, %s395_s26  ;;  %p667_p11 = scmp.ne.s32.totalorder %s662_s24, 0 }
  0x3b   : > { %s464_s16 = smov [#allocation5]  }
  0x3c   : > { %p397_p12 = pnand %p396_p6, %p667_p11  ;;  %s399_s27 = sshll.u32 %s464_s16, 4  ;;  %s400_s27 = int_to_ptr.vmem [resolvable:$false] %s399_s27 }
  0x3d   : > { %s401_s28 = scalar_lea.vmem %s400_s27, 256  ;;  %p402_p7 = scmp.lt.s32.totalorder %s612_s11, %s400_s27 }
  0x3e   : > { %p398_p13 = pneg %p397_p12  ;;  %p403_p10 = scmp.lt.s32.totalorder %s401_s28, %s395_s26 }
  0x40   : > { %p404_p2 = por %p403_p10, %p402_p7 }
  0x42   : > { %p405_p4 = pnand %p404_p2, %p398_p13 }
  0xc6   : > { %v190_v2 = vpop.xlane.xlu0 %189 }
  0xc7   : > { %v192_v3 = vmul.f32 0.03125, %v190_v2 }
  0xc9   : > { %v193_v4 = vsub.f32 %v186_v0, %v192_v3 }
  0xcb   : > { %v194_v5 = vmul.f32 %v193_v4, %v193_v4 }
  0xcd   : > { %v195_v6 = vsel %vm187_vm0, %v194_v5, 0.0 }
  0xce   : > { %196 = vadd.xlane.f32.xlu0 %v195_v6 }
 0x15b   : > { %v197_v7 = vpop.xlane.xlu0 %196 }
 0x15c   : > { %v198_v8 = vmul.f32 0.03125, %v197_v7 }
 0x15e   : > { %v199_v9 = vadd.f32 1e-05, %v198_v8 }
 0x160   : > { %363 = vrsqrt.f32 %v199_v9 }
 0x16a   : > { %v364_v10 = vpop.eup %363 }
 0x16b   : > { %v201_v12 = vmul.f32 %v364_v10, %v193_v4 }
 0x16d   : > { %v209_v14 = vmul.f32 %v311_v11, %v201_v12 }
 0x16f   : > { %v217_v15 = vadd.f32 %v312_v13, %v209_v14 }
 0x171   : > { %218 = vst.msk [vmem:[%s185_s10] sm:$0xff] %vm187_vm0, %v217_v15 }
 0x172   : > { %408 = shalt.err (!%p405_p4)
}
 0x173   : > { %s409_s29 = scalar_lea.hbm %s610_s20, 128  ;;  %s413_s9 = scalar_lea.hbm %s658_s3, 256 }
 0x174   : > { %p410_p5 = scmp.ne.s32.totalorder %s610_s20, %s409_s29  ;;  %p414_p0 = scmp.lt.u32.totalorder %s610_s20, %s658_s3 }
 0x175   : > { %p415_p1 = scmp.lt.u32.totalorder %s413_s9, %s409_s29  ;;  %p417_p6 = scmp.lt.u32.totalorder %s409_s29, %s610_s20 }
 0x176   : > { %p411_p8 = pnand %p410_p5, %p667_p11 }
 0x177   : > { %p416_p3 = por %p415_p1, %p414_p0 }
 0x178   : > { %p412_p9 = pneg %p411_p8 }
 0x179   : > { %p418_p12 = por %p417_p6, %p416_p3 }
 0x17b   : > { %p419_p13 = pnand %p418_p12, %p412_p9 }
 0x17d   : > { %422 = shalt.err (!%p419_p13)
}
 0x17e   : > { %319 = dma.vmem_to_hbm [thread:$0]  (%p667_p11), %s612_s11, 128, %s610_s20, %s220_s22  }
 0x17f PF: > { %s245_s6 = sand.u32 1, %s449_s12   ;;  %p668_p7 = scmp.ne.s32.totalorder %s663_s25, 0 }
 0x180   : > { %p669_p10 = scmp.ge.s32.totalorder %s461_s15, 2  ;;  %s246_s7 = scalar_lea.sflag [#allocation4], %s245_s6 }
 0x182   : > { %p326_p2 = pnand %p669_p10, %p668_p7 }
 0x184   : > { %444 = dma.done.wait (!%p326_p2), %s246_s7, 128  }
 0x185   : > { %446 = vsyncadd (!%p326_p2), %s246_s7, 4294967168  ;;  %p16_p4 = scmp.ge.s32.totalorder %s510_s18, 4   ;;  %s670_s12 = smov %s453_s13 }
 0x186   : > { %s671_s13 = smov %s457_s14  ;;  %s672_s14 = smov %s522_s21 }
 0x187   : > { %s673_s15 = smov %s510_s18  ;;  %18 = sbr.rel (!%p16_p4) target bundleno = 5 (0x5), region = 77 }
 0x18e   :  { %251 = vsyncpa [#allocation3], 1 }
 0x18f   :  { %253 = vsyncpa [#allocation3 + $0x1], 1 }
 0x190   :  { %254 = vsyncpa [#allocation4], 1 }
 0x191   :  { %256 = vsyncpa [#allocation4 + $0x1], 1 }

</bundles_post_ra>
